<compile_context>
chip_gen: v6e
topology: v6e:2x2x1
jax: 0.10.0
libtpu: 0.0.40
codegen_flags: <defaults>
</compile_context>

<pallas_src>
import functools

import jax
import jax.numpy as jnp
import numpy as np
from jax.experimental import pallas as pl
from jax.experimental.pallas import tpu as pltpu


_CHUNK = 512        # lanes folded per inner (unrolled) step
_MAX_CHUNKS = 128   # cap on the unrolled chunk count per grid step


def _round_up(v, m):
    return (v + m - 1) // m * m


def _cdiv(a, b):
    return -(-a // b)


def _choose_tile(hw, c, x_itemsize, max_tile_hw=None):
    """Pick (tile, chunk): tile = spatial lanes per grid step, chunk = lanes per
    unrolled inner fold step.  Targets ~0.5-2 MiB x blocks (>=85% of HBM
    roofline per measured BlockSpec pipelining data) while bounding the inner
    unroll and keeping VMEM use far below v7x's 64 MiB per-TC VMEM."""
    # Keep 3 register partials + one x chunk comfortably inside 64 vregs.
    if c <= 24:
        chunk_cap = 512
    elif c <= 48:
        chunk_cap = 256
    else:
        chunk_cap = 128

    hw128 = _round_up(hw, 128)
    t_max = min((2 << 20) // max(1, c * x_itemsize), _MAX_CHUNKS * _CHUNK)
    if max_tile_hw is not None:
        t_max = min(t_max, _round_up(int(max_tile_hw), 128))
    t_max = max(_CHUNK, (t_max // _CHUNK) * _CHUNK)

    if hw128 <= t_max:
        # One tile covers the spatial axis; keep it 512-aligned when that
        # avoids a very long 128-lane-chunk unroll.
        tile = hw128 if (hw128 % _CHUNK == 0 or hw128 <= 16 * _CHUNK) \
            else _round_up(hw128, _CHUNK)
    else:
        tile = t_max

    if tile % 512 == 0:
        chunk = 512
    elif tile % 256 == 0:
        chunk = 256
    else:
        chunk = 128
    chunk = min(chunk, chunk_cap)
    while tile % chunk != 0:   # always terminates at >=128 (tile % 128 == 0)
        chunk //= 2
    return tile, chunk


def _dice_stats_kernel(x_ref, y_ref, out_ref, acc_tp, acc_x, acc_cnt, *,
                       hw, tiles_per_split, chunk, need_mask):
    # x_ref: (1, C, TILE) float ; y_ref: (1, 1, TILE) int labels
    # out_ref: (1, 1, C, 3) f32 -> [tp, sum_x, count] per class
    # acc_*: (C, 128) f32 scratch persisting across the tile axis.
    t = pl.program_id(2)

    @pl.when(t == 0)
    def _init():
        acc_tp[...] = jnp.zeros_like(acc_tp)
        acc_x[...] = jnp.zeros_like(acc_x)
        acc_cnt[...] = jnp.zeros_like(acc_cnt)

    c = x_ref.shape[1]
    tile = x_ref.shape[2]
    n_chunks = tile // chunk

    chan = jax.lax.broadcasted_iota(jnp.int32, (c, 1), 0)          # hoisted
    if need_mask:
        lane = jax.lax.broadcasted_iota(jnp.int32, (1, chunk), 1)
        # Nominal element offset of this tile (index_map clamps the DMA; the
        # mask must use the *unclamped* offset so duplicated blocks contribute 0).
        tile_start = (pl.program_id(1) * tiles_per_split + t) * tile

    ptp = jnp.zeros((c, chunk), jnp.float32)
    px = jnp.zeros((c, chunk), jnp.float32)
    pcnt = jnp.zeros((c, chunk), jnp.float32)

    # Static unroll over lane-aligned chunks; partials stay in registers, so the
    # hot loop issues no accumulator loads/stores (vst slot stays free).
    for j in range(n_chunks):
        lo = j * chunk
        xc = x_ref[0, :, lo:lo + chunk].astype(jnp.float32)        # (C, chunk)
        yc = y_ref[0, :, lo:lo + chunk].astype(jnp.int32)          # (1, chunk)
        oh = yc == chan                                            # (C, chunk)
        if need_mask:
            valid = lane < (hw - lo - tile_start)                  # (1, chunk)
            oh = jnp.logical_and(oh, valid)
            xc = jnp.where(valid, xc, 0.0)     # selects (not mul): OOB garbage
        px = px + xc                           # (incl. NaN) can never leak in.
        ptp = ptp + jnp.where(oh, xc, 0.0)
        pcnt = pcnt + jnp.where(oh, 1.0, 0.0)

    def _fold128(v):                           # lane-aligned pairwise halving
        w = v.shape[-1]
        while w > 128:
            w //= 2
            v = v[:, :w] + v[:, w:2 * w]
        return v

    # Single RMW per stat into tiny (C, 128) scratch per grid step.
    acc_tp[...] += _fold128(ptp)
    acc_x[...] += _fold128(px)
    acc_cnt[...] += _fold128(pcnt)

    @pl.when(t == pl.num_programs(2) - 1)
    def _finalize():
        tp = jnp.sum(acc_tp[...], axis=-1, keepdims=True)          # (C, 1)
        sx = jnp.sum(acc_x[...], axis=-1, keepdims=True)
        cn = jnp.sum(acc_cnt[...], axis=-1, keepdims=True)
        out_ref[0, 0] = jnp.concatenate([tp, sx, cn], axis=-1)     # (C, 3)


def _dice_stats(x_bcl, y_b1l, hw, tile, chunk, n_splits):
    """x_bcl: (B, C, HW) float, y_b1l: (B, 1, HW) int labels.
    Returns (B, n_splits, C, 3) f32 with [tp, sum_x, count] partials."""
    B, C, L = x_bcl.shape
    assert L == hw
    n_total = _cdiv(hw, tile)
    nts = _cdiv(n_total, n_splits)
    need_mask = (n_splits * nts * tile) != hw
    last = n_total - 1

    def xy_map(b, s, t):
        # Clamp so no block is ever DMA'd from fully past the array end; the
        # kernel masks such (duplicated) blocks to zero via the nominal offset.
        return (b, 0, jnp.minimum(s * nts + t, last))

    kernel = functools.partial(_dice_stats_kernel, hw=hw, tiles_per_split=nts,
                               chunk=chunk, need_mask=need_mask)

    vmem_need = (2 * (C * tile * x_bcl.dtype.itemsize
                      + tile * y_b1l.dtype.itemsize)
                 + 3 * C * 128 * 4 + (1 << 20))
    vmem_limit = int(min(48 * 1024 * 1024, max(16 * 1024 * 1024, 2 * vmem_need)))

    return pl.pallas_call(
        kernel,
        out_shape=jax.ShapeDtypeStruct((B, n_splits, C, 3), jnp.float32),
        grid_spec=pltpu.PrefetchScalarGridSpec(
            num_scalar_prefetch=0,
            grid=(B, n_splits, nts),
            in_specs=[
                pl.BlockSpec((1, C, tile), xy_map),
                pl.BlockSpec((1, 1, tile), xy_map),
            ],
            out_specs=pl.BlockSpec((1, 1, C, 3), lambda b, s, t: (b, s, 0, 0)),
            scratch_shapes=[
                pltpu.VMEM((C, 128), jnp.float32),
                pltpu.VMEM((C, 128), jnp.float32),
                pltpu.VMEM((C, 128), jnp.float32),
            ],
        ),
        compiler_params=pltpu.CompilerParams(
            dimension_semantics=("parallel", "parallel", "arbitrary"),
            vmem_limit_bytes=vmem_limit,
        ),
    )(x_bcl, y_b1l)


def soft_dice_loss(x, y, smooth=1.0, max_tile_hw=None):
    """SoftDiceLoss.forward with ctor defaults (batch_dice=False, do_bg=True,
    apply_nonlin=None, clip_tp=None; ddp path inactive) and loss_mask=None.

    x: (B, C, *spatial) float net output (f32 or bf16 streamed as-is).
    y: (B, 1, *spatial) or (B, *spatial) integer label map.  Labels outside
       [0, C) contribute an all-zero one-hot row.
    """
    # TODO(synk): already-one-hot y (y.shape == x.shape), loss_mask, and the
    # batch_dice/ddp AllGatherGrad paths are not implemented (unused under the
    # module's default arguments).
    B, C = x.shape[0], x.shape[1]
    HW = int(np.prod(x.shape[2:]))

    if x.dtype not in (jnp.float32, jnp.bfloat16):
        x = x.astype(jnp.float32)
    x = x.reshape(B, C, HW)            # free reshape of NC[spatial] -- no transpose

    if not (jnp.issubdtype(y.dtype, jnp.integer) and y.dtype.itemsize <= 4):
        y = y.astype(jnp.int32)        # keep int8/int16/int32 labels as-is
    y = y.reshape(B, 1, HW)

    tile, chunk = _choose_tile(HW, C, x.dtype.itemsize, max_tile_hw)
    n_total = _cdiv(HW, tile)
    # Split the spatial axis across a second "parallel" grid slot when B alone
    # can't keep both v7x TensorCores busy (no effect on single-TC v5e/v6e).
    n_splits = 2 if (B % 2 == 1 and n_total >= 2) else 1

    stats = _dice_stats(x, y, HW, tile, chunk, n_splits)   # (B, S, C, 3)
    stats = jnp.sum(stats, axis=1)                         # (B, C, 3)
    tp = stats[..., 0]
    fp = stats[..., 1] - tp            # sum(x)   - tp == sum(x * (1 - y_oh))
    fn = stats[..., 2] - tp            # count(y) - tp == sum((1 - x) * y_oh)

    nominator = 2.0 * tp + smooth
    denominator = 2.0 * tp + fp + fn + smooth
    dc = nominator / jnp.clip(denominator, 1e-8)
    return -jnp.mean(dc)


def _reference_soft_dice_loss(x, y, smooth=1.0):
    """Pure-JAX reference mirroring the PyTorch code exactly."""
    B, C = x.shape[0], x.shape[1]
    xf = x.astype(jnp.float32).reshape(B, C, -1)
    yl = y.reshape(B, -1).astype(jnp.int32)
    y_oh = jax.nn.one_hot(yl, C, axis=1, dtype=jnp.float32)   # (B, C, HW)
    tp = jnp.sum(xf * y_oh, axis=-1)
    fp = jnp.sum(xf * (1.0 - y_oh), axis=-1)
    fn = jnp.sum((1.0 - xf) * y_oh, axis=-1)
    dc = (2.0 * tp + smooth) / jnp.clip(2.0 * tp + fp + fn + smooth, 1e-8)
    return -jnp.mean(dc)


if __name__ == "__main__":
    root = jax.random.PRNGKey(0)

    def _check(idx, shape_x, n_classes, max_tile_hw=None, x_dtype=jnp.float32):
        kx, ky = jax.random.split(jax.random.fold_in(root, idx))
        x = jax.random.uniform(kx, shape_x, dtype=jnp.float32).astype(x_dtype)
        y = jax.random.randint(ky, (shape_x[0], 1) + shape_x[2:], 0, n_classes,
                               dtype=jnp.int32)
        got = jax.block_until_ready(soft_dice_loss(x, y, max_tile_hw=max_tile_hw))
        ref = jax.block_until_ready(_reference_soft_dice_loss(x, y))
        np.testing.assert_allclose(np.asarray(got), np.asarray(ref),
                                   rtol=1e-5, atol=1e-5)

    # primary small case (B=2, C=4, 16x16): single tile, no masking, no split
    _check(0, (2, 4, 16, 16), 4)
    # ragged spatial extent (HW=204): in-kernel tail masking, B=1
    _check(1, (1, 3, 12, 17), 3)
    # multi-tile accumulation (tile forced small), even B -> no spatial split
    _check(2, (2, 4, 64, 64), 4, max_tile_hw=1024)
    # B=1 with several tiles: 2-way spatial split + partial-sum in JAX glue
    _check(3, (1, 4, 64, 64), 4, max_tile_hw=1024)
    # odd tile count under the split: clamped (fully-masked) trailing tile
    _check(4, (1, 4, 48, 64), 4, max_tile_hw=1024)
    # bf16 activations streamed directly (cast to f32 per chunk in-kernel)
    _check(5, (2, 4, 32, 32), 4, x_dtype=jnp.bfloat16)

    print("KERNEL_OK")
</pallas_src>

<mosaic_0001>
module attributes {stable_mosaic.version = 11 : i64} {
  func.func @_dice_stats_kernel(%arg0: i32, %arg1: i32, %arg2: i32, %arg3: memref<1x4x256xf32, #tpu.memory_space<vmem>>, %arg4: memref<1x1x256xi32, #tpu.memory_space<vmem>>, %arg5: memref<1x1x4x3xf32, #tpu.memory_space<vmem>>, %arg6: memref<4x128xf32, #tpu.memory_space<vmem>>, %arg7: memref<4x128xf32, #tpu.memory_space<vmem>>, %arg8: memref<4x128xf32, #tpu.memory_space<vmem>>) attributes {dimension_semantics = [#tpu.dimension_semantics<parallel>, #tpu.dimension_semantics<parallel>, #tpu.dimension_semantics<arbitrary>], iteration_bounds = array<i64: 2, 1, 1>, scalar_prefetch = 0 : i64, scratch_operands = 3 : i64, tpu.core_type = #tpu.core_type<tc>, window_params = [{transform_indices = @transform_0, window_bounds = array<i64: 1, 4, 256>}, {transform_indices = @transform_1, window_bounds = array<i64: 1, 1, 256>}, {transform_indices = @transform_2, window_bounds = array<i64: 1, 1, 4, 3>}]} {
    %c0_i32 = arith.constant 0 : i32
    %0 = arith.cmpi eq, %arg2, %c0_i32 : i32
    %1 = arith.extui %0 : i1 to i32
    %c0_i32_0 = arith.constant 0 : i32
    %2 = arith.cmpi ne, %1, %c0_i32_0 : i32
    scf.if %2 {
      %cst_25 = arith.constant 0.000000e+00 : f32
      %43 = vector.broadcast %cst_25 : f32 to vector<4x128xf32>
      %c0_26 = arith.constant 0 : index
      %c0_27 = arith.constant 0 : index
      %44 = vector.load %arg6[%c0_26, %c0_27] : memref<4x128xf32, #tpu.memory_space<vmem>>, vector<4x128xf32>
      tpu.vector_store %arg6[%c0_26, %c0_27], %43 {strides = array<i32>} : memref<4x128xf32, #tpu.memory_space<vmem>>, vector<4x128xf32>,
      %cst_28 = arith.constant 0.000000e+00 : f32
      %45 = vector.broadcast %cst_28 : f32 to vector<4x128xf32>
      %c0_29 = arith.constant 0 : index
      %c0_30 = arith.constant 0 : index
      %46 = vector.load %arg7[%c0_29, %c0_30] : memref<4x128xf32, #tpu.memory_space<vmem>>, vector<4x128xf32>
      tpu.vector_store %arg7[%c0_29, %c0_30], %45 {strides = array<i32>} : memref<4x128xf32, #tpu.memory_space<vmem>>, vector<4x128xf32>,
      %cst_31 = arith.constant 0.000000e+00 : f32
      %47 = vector.broadcast %cst_31 : f32 to vector<4x128xf32>
      %c0_32 = arith.constant 0 : index
      %c0_33 = arith.constant 0 : index
      %48 = vector.load %arg8[%c0_32, %c0_33] : memref<4x128xf32, #tpu.memory_space<vmem>>, vector<4x128xf32>
      tpu.vector_store %arg8[%c0_32, %c0_33], %47 {strides = array<i32>} : memref<4x128xf32, #tpu.memory_space<vmem>>, vector<4x128xf32>,
    } else {
    }
    %3 = tpu.iota {dimensions = array<i32: 0>} : vector<4x1xi32>
    %cst = arith.constant 0.000000e+00 : f32
    %4 = vector.broadcast %cst : f32 to vector<4x256xf32>
    %cst_1 = arith.constant 0.000000e+00 : f32
    %5 = vector.broadcast %cst_1 : f32 to vector<4x256xf32>
    %cst_2 = arith.constant 0.000000e+00 : f32
    %6 = vector.broadcast %cst_2 : f32 to vector<4x256xf32>
    %c0 = arith.constant 0 : index
    %c0_3 = arith.constant 0 : index
    %c0_4 = arith.constant 0 : index
    %7 = vector.load %arg3[%c0, %c0_3, %c0_4] : memref<1x4x256xf32, #tpu.memory_space<vmem>>, vector<1x4x256xf32>
    %8 = vector.shape_cast %7 : vector<1x4x256xf32> to vector<4x256xf32>
    %c0_5 = arith.constant 0 : index
    %c0_6 = arith.constant 0 : index
    %c0_7 = arith.constant 0 : index
    %9 = vector.load %arg4[%c0_5, %c0_6, %c0_7] : memref<1x1x256xi32, #tpu.memory_space<vmem>>, vector<1x1x256xi32>
    %10 = vector.shape_cast %9 : vector<1x1x256xi32> to vector<1x256xi32>
    %11 = vector.broadcast %10 : vector<1x256xi32> to vector<4x256xi32>
    %12 = vector.broadcast %3 : vector<4x1xi32> to vector<4x256xi32>
    %13 = arith.cmpi eq, %11, %12 : vector<4x256xi32>
    %14 = arith.addf %5, %8 : vector<4x256xf32>
    %cst_8 = arith.constant 0.000000e+00 : f32
    %15 = vector.broadcast %cst_8 : f32 to vector<4x256xf32>
    %16 = arith.select %13, %8, %15 : vector<4x256xi1>, vector<4x256xf32>
    %17 = arith.addf %4, %16 : vector<4x256xf32>
    %cst_9 = arith.constant 1.000000e+00 : f32
    %cst_10 = arith.constant 0.000000e+00 : f32
    %18 = vector.broadcast %cst_9 : f32 to vector<4x256xf32>
    %19 = vector.broadcast %cst_10 : f32 to vector<4x256xf32>
    %20 = arith.select %13, %18, %19 : vector<4x256xi1>, vector<4x256xf32>
    %21 = arith.addf %6, %20 : vector<4x256xf32>
    %c0_11 = arith.constant 0 : index
    %c0_12 = arith.constant 0 : index
    %22 = vector.load %arg6[%c0_11, %c0_12] : memref<4x128xf32, #tpu.memory_space<vmem>>, vector<4x128xf32>
    %23 = vector.extract_strided_slice %17 {offsets = [0, 0], sizes = [4, 128], strides = [1, 1]} : vector<4x256xf32> to vector<4x128xf32>
    %24 = vector.extract_strided_slice %17 {offsets = [0, 128], sizes = [4, 128], strides = [1, 1]} : vector<4x256xf32> to vector<4x128xf32>
    %25 = arith.addf %23, %24 : vector<4x128xf32>
    %26 = arith.addf %22, %25 : vector<4x128xf32>
    %c0_13 = arith.constant 0 : index
    %c0_14 = arith.constant 0 : index
    %27 = vector.load %arg6[%c0_13, %c0_14] : memref<4x128xf32, #tpu.memory_space<vmem>>, vector<4x128xf32>
    tpu.vector_store %arg6[%c0_13, %c0_14], %26 {strides = array<i32>} : memref<4x128xf32, #tpu.memory_space<vmem>>, vector<4x128xf32>,
    %c0_15 = arith.constant 0 : index
    %c0_16 = arith.constant 0 : index
    %28 = vector.load %arg7[%c0_15, %c0_16] : memref<4x128xf32, #tpu.memory_space<vmem>>, vector<4x128xf32>
    %29 = vector.extract_strided_slice %14 {offsets = [0, 0], sizes = [4, 128], strides = [1, 1]} : vector<4x256xf32> to vector<4x128xf32>
    %30 = vector.extract_strided_slice %14 {offsets = [0, 128], sizes = [4, 128], strides = [1, 1]} : vector<4x256xf32> to vector<4x128xf32>
    %31 = arith.addf %29, %30 : vector<4x128xf32>
    %32 = arith.addf %28, %31 : vector<4x128xf32>
    %c0_17 = arith.constant 0 : index
    %c0_18 = arith.constant 0 : index
    %33 = vector.load %arg7[%c0_17, %c0_18] : memref<4x128xf32, #tpu.memory_space<vmem>>, vector<4x128xf32>
    tpu.vector_store %arg7[%c0_17, %c0_18], %32 {strides = array<i32>} : memref<4x128xf32, #tpu.memory_space<vmem>>, vector<4x128xf32>,
    %c0_19 = arith.constant 0 : index
    %c0_20 = arith.constant 0 : index
    %34 = vector.load %arg8[%c0_19, %c0_20] : memref<4x128xf32, #tpu.memory_space<vmem>>, vector<4x128xf32>
    %35 = vector.extract_strided_slice %21 {offsets = [0, 0], sizes = [4, 128], strides = [1, 1]} : vector<4x256xf32> to vector<4x128xf32>
    %36 = vector.extract_strided_slice %21 {offsets = [0, 128], sizes = [4, 128], strides = [1, 1]} : vector<4x256xf32> to vector<4x128xf32>
    %37 = arith.addf %35, %36 : vector<4x128xf32>
    %38 = arith.addf %34, %37 : vector<4x128xf32>
    %c0_21 = arith.constant 0 : index
    %c0_22 = arith.constant 0 : index
    %39 = vector.load %arg8[%c0_21, %c0_22] : memref<4x128xf32, #tpu.memory_space<vmem>>, vector<4x128xf32>
    tpu.vector_store %arg8[%c0_21, %c0_22], %38 {strides = array<i32>} : memref<4x128xf32, #tpu.memory_space<vmem>>, vector<4x128xf32>,
    %c0_i32_23 = arith.constant 0 : i32
    %40 = arith.cmpi eq, %arg2, %c0_i32_23 : i32
    %41 = arith.extui %40 : i1 to i32
    %c0_i32_24 = arith.constant 0 : i32
    %42 = arith.cmpi ne, %41, %c0_i32_24 : i32
    scf.if %42 {
      %c0_25 = arith.constant 0 : index
      %c0_26 = arith.constant 0 : index
      %43 = vector.load %arg6[%c0_25, %c0_26] : memref<4x128xf32, #tpu.memory_space<vmem>>, vector<4x128xf32>
      %cst_27 = arith.constant dense<0.000000e+00> : vector<4xf32>
      %44 = vector.multi_reduction <add>, %43, %cst_27 [1] : vector<4x128xf32> to vector<4xf32>
      %45 = vector.shape_cast %44 : vector<4xf32> to vector<4x1xf32>
      %c0_28 = arith.constant 0 : index
      %c0_29 = arith.constant 0 : index
      %46 = vector.load %arg7[%c0_28, %c0_29] : memref<4x128xf32, #tpu.memory_space<vmem>>, vector<4x128xf32>
      %cst_30 = arith.constant dense<0.000000e+00> : vector<4xf32>
      %47 = vector.multi_reduction <add>, %46, %cst_30 [1] : vector<4x128xf32> to vector<4xf32>
      %48 = vector.shape_cast %47 : vector<4xf32> to vector<4x1xf32>
      %c0_31 = arith.constant 0 : index
      %c0_32 = arith.constant 0 : index
      %49 = vector.load %arg8[%c0_31, %c0_32] : memref<4x128xf32, #tpu.memory_space<vmem>>, vector<4x128xf32>
      %cst_33 = arith.constant dense<0.000000e+00> : vector<4xf32>
      %50 = vector.multi_reduction <add>, %49, %cst_33 [1] : vector<4x128xf32> to vector<4xf32>
      %51 = vector.shape_cast %50 : vector<4xf32> to vector<4x1xf32>
      %52 = tpu.concatenate %45, %48, %51 in 1 : vector<4x1xf32>, vector<4x1xf32>, vector<4x1xf32> -> vector<4x3xf32>
      %c0_34 = arith.constant 0 : index
      %c0_35 = arith.constant 0 : index
      %c0_36 = arith.constant 0 : index
      %c0_37 = arith.constant 0 : index
      %53 = vector.load %arg5[%c0_34, %c0_35, %c0_36, %c0_37] : memref<1x1x4x3xf32, #tpu.memory_space<vmem>>, vector<1x1x4x3xf32>
      %54 = vector.shape_cast %53 : vector<1x1x4x3xf32> to vector<4x3xf32>
      %55 = vector.shape_cast %52 : vector<4x3xf32> to vector<1x1x4x3xf32>
      tpu.vector_store %arg5[%c0_34, %c0_35, %c0_36, %c0_37], %55 {strides = array<i32>} : memref<1x1x4x3xf32, #tpu.memory_space<vmem>>, vector<1x1x4x3xf32>,
    } else {
    }
    return
  }
  func.func @transform_0(%arg0: i32, %arg1: i32, %arg2: i32) -> (i32, i32, i32) {
    %c1_i32 = arith.constant 1 : i32
    %0 = arith.muli %arg1, %c1_i32 : i32
    %1 = arith.addi %0, %arg2 : i32
    %c0_i32 = arith.constant 0 : i32
    %2 = arith.minsi %1, %c0_i32 : i32
    %c0_i32_0 = arith.constant 0 : i32
    %c0_i32_1 = arith.constant 0 : i32
    return %arg0, %c0_i32_0, %2 : i32, i32, i32
  }
  func.func @transform_1(%arg0: i32, %arg1: i32, %arg2: i32) -> (i32, i32, i32) {
    %c1_i32 = arith.constant 1 : i32
    %0 = arith.muli %arg1, %c1_i32 : i32
    %1 = arith.addi %0, %arg2 : i32
    %c0_i32 = arith.constant 0 : i32
    %2 = arith.minsi %1, %c0_i32 : i32
    %c0_i32_0 = arith.constant 0 : i32
    %c0_i32_1 = arith.constant 0 : i32
    return %arg0, %c0_i32_0, %2 : i32, i32, i32
  }
  func.func @transform_2(%arg0: i32, %arg1: i32, %arg2: i32) -> (i32, i32, i32, i32) {
    %c0_i32 = arith.constant 0 : i32
    %c0_i32_0 = arith.constant 0 : i32
    %c0_i32_1 = arith.constant 0 : i32
    return %arg0, %arg1, %c0_i32, %c0_i32_0 : i32, i32, i32, i32
  }
}

</mosaic_0001>

<bundles_post_ra>
// kernel: tpu_custom_call.1
= control target key start
LH: loop header
LB: loop body
LE: loop exit
PB: predicated region body
PF: predicated region fallthrough
CT: control target
= control target key end

     0   :  { %7 = vsyncpa [#allocation6], 0  ;;  %s782_s0 = inlined_call_operand.hbm [shape: f32[2,4,256], index: 0, kind: input, shape index: {}]   ;;  %s783_s1 = inlined_call_operand.hbm [shape: s32[2,1,256], index: 1, kind: input, shape index: {}]   ;;  %s784_s2 = inlined_call_operand.vmem [shape: f32[2,1,4,3], index: 2, kind: output, shape index: {}]  }
   0x1   :  { %9 = vsyncpa [#allocation6 + $0x1], 0 }
   0x2   :  { %10 = vsyncpa [#allocation8], 0 }
   0x3   :  { %12 = vsyncpa [#allocation8 + $0x1], 0  ;;  %s654_s9 = smov 0   ;;  %s656_s10 = smov 0  }
   0x4   :  { %s658_s11 = smov 0   ;;  %s660_s12 = smov 0  }
   0x5   :  { %s662_s13 = smov 0   ;;  %s664_s14 = smov 0  }
   0x6 LB: > { %s444_s15 = sadd.s32 4294967295, %s634_s14   ;;  %s37_s16 = sadd.s32 1, %s630_s13  ;;  %s634_s14 = sphi %s664_s14, %s18_s14   ;;  %s630_s13 = sphi %s662_s13, %s793_s13   ;;  %s626_s12 = sphi %s660_s12, %s792_s12   ;;  %s622_s11 = sphi %s658_s11, %s791_s11   ;;  %s618_s10 = sphi %s656_s10, %s790_s10   ;;  %s614_s9 = sphi %s654_s9, %s789_s9  }
   0x7   : > { %p39_p0 = scmp.ge.s32.totalorder %s37_s16, 2  ;;  %s52_s17 = sadd.s32 1, %s622_s11 }
   0x8   : > { %p59_p1 = scmp.ne.s32.totalorder %s622_s11, %s618_s10  ;;  %p60_p2 = scmp.eq.s32.totalorder %s634_s14, 0 }
   0x9   : > { %s795_s16 = smov (%p39_p0, %s37_s16), 0  ;;  %p65_p4 = scmp.ne.s32.totalorder %s618_s10, %s614_s9 }
   0xa   : > { %p690_p3 = por %p60_p2, %p59_p1  ;;  %s47_s19 = ssub.s32 %s630_s13, %s795_s16 }
   0xb   : > { %p66_p5 = scmp.eq.s32.totalorder %s444_s15, 0  ;;  %p50_p6 = scmp.eq.s32.totalorder %s47_s19, 0 }
   0xc   : > { %p473_p8 = scmp.lt.s32.totalorder %s634_s14, 2  ;;  %s706_s22 = sand.u32 1, %s622_s11  }
   0xd   : > { %p697_p7 = por %p66_p5, %p65_p4  ;;  %s460_s23 = sshll.u32 %s630_s13, 7 }
   0xe   : > { %s703_s21 = scalar_select %p50_p6, %s622_s11, %s52_s17  }
   0xf   : > { %s448_s24 = sshll.u32 %s706_s22, 3  ;;  %s166_s27 = scalar_lea.hbm %s782_s0, %s460_s23 }
  0x10   : > { %s155_s28 = scalar_lea.vmem [#allocation5], %s448_s24  ;;  %p715_p9 = pnand %p473_p8, %p690_p3 }
  0x11   : > { %s168_s29 = sshll.u32 %s155_s28, 4  ;;  %p454_p10 = scmp.ge.s32.totalorder %s634_s14, 1  ;;  %s169_s29 = int_to_ptr.vmem [resolvable:$true] %s168_s29 }
  0x12   : > { %p197_p11 = scmp.lt.s32.totalorder %s634_s14, 3  ;;  %s152_s3 = scalar_lea.sflag [#allocation6], %s706_s22 }
  0x13   : > { %p526_p12 = pneg %p715_p9  ;;  %s537_s4 = scalar_lea.vmem %s169_s29, 128 }
  0x14   : > { %p538_p13 = scmp.ne.s32.totalorder %s169_s29, %s537_s4  ;;  %s636_s5 = smov [#allocation5]  }
  0x15   : > { %s542_s6 = sshll.u32 %s636_s5, 4  ;;  %s543_s6 = int_to_ptr.vmem [resolvable:$false] %s542_s6 }
  0x16   : > { %p540_p0 = pnand %p538_p13, %p526_p12  ;;  %s544_s7 = scalar_lea.vmem %s543_s6, 256 }
  0x17   : > { %p545_p2 = scmp.lt.s32.totalorder %s169_s29, %s543_s6  ;;  %p546_p3 = scmp.lt.s32.totalorder %s544_s7, %s537_s4 }
  0x18   : > { %p541_p1 = pneg %p540_p0 }
  0x19   : > { %p547_p4 = por %p546_p3, %p545_p2 }
  0x1b   : > { %p548_p5 = pnand %p547_p4, %p541_p1 }
  0x1d   : > { %551 = shalt.err (!%p548_p5)
}
  0x1e   : > { %469 = dma.hbm_to_vmem [thread:$0]  (!%p715_p9), %s166_s27, 128, %s169_s29, %s152_s3  }
  0x1f   : > { %p733_p6 = pnand %p454_p10, %p197_p11  ;;  %s451_s9 = sshll.u32 %s706_s22, 1 }
  0x20   : > { %s461_s15 = sshll.u32 %s630_s13, 5  ;;  %s179_s23 = scalar_lea.vmem [#allocation7], %s451_s9 }
  0x21   : > { %s190_s19 = scalar_lea.hbm %s783_s1, %s461_s15  ;;  %s192_s24 = sshll.u32 %s179_s23, 4  ;;  %s193_s24 = int_to_ptr.vmem [resolvable:$true] %s192_s24 }
  0x22   : > { %s176_s25 = scalar_lea.sflag [#allocation8], %s706_s22  ;;  %s565_s26 = scalar_lea.vmem %s193_s24, 32 }
  0x23   : > { %p566_p8 = scmp.ne.s32.totalorder %s193_s24, %s565_s26  ;;  %s637_s27 = smov [#allocation7]  }
  0x24   : > { %s570_s28 = sshll.u32 %s637_s27, 4  ;;  %s571_s28 = int_to_ptr.vmem [resolvable:$false] %s570_s28 }
  0x25   : > { %p568_p13 = pnand %p566_p8, %p526_p12  ;;  %s572_s29 = scalar_lea.vmem %s571_s28, 64 }
  0x26   : > { %p573_p10 = scmp.lt.s32.totalorder %s193_s24, %s571_s28  ;;  %p574_p11 = scmp.lt.s32.totalorder %s572_s29, %s565_s26 }
  0x27   : > { %p569_p0 = pneg %p568_p13 }
  0x28   : > { %p575_p1 = por %p574_p11, %p573_p10 }
  0x2a   : > { %p576_p2 = pnand %p575_p1, %p569_p0 }
  0x2c   : > { %579 = shalt.err (!%p576_p2)
}
  0x2d   : > { %472 = dma.hbm_to_vmem [thread:$0]  (!%p715_p9), %s190_s19, 32, %s193_s24, %s176_s25  }
  0x2e   : > { %201 = sbr.rel (%p733_p6) target bundleno = 223 (0xdf), region = 28  ;;  %s203_s22 = sand.u32 (!%p733_p6), 1, %s618_s10  }
  0x2f   : > { %s455_s3 = sshll.u32 (!%p733_p6), %s203_s22, 3  ;;  %s204_s4 = scalar_lea.sflag (!%p733_p6), [#allocation6], %s203_s22 }
  0x30   : > { %s207_s5 = scalar_lea.vmem (!%p733_p6), [#allocation5], %s455_s3 }
  0x33   : > { %605 = dma.done.wait (%p697_p7), %s204_s4, 128  }
  0x34   : > { %607 = vsyncadd (%p697_p7), %s204_s4, 4294967168  ;;  %s456_s6 = sshll.u32 %s203_s22, 1  ;;  %s213_s7 = scalar_lea.sflag [#allocation8], %s203_s22 }
  0x35   : > { %s216_s9 = scalar_lea.vmem [#allocation7], %s456_s6 }
  0x36   : > { %609 = dma.done.wait (%p697_p7), %s213_s7, 32  }
  0x37   : > { %611 = vsyncadd (%p697_p7), %s213_s7, 4294967264  ;;  %v266_v0 = vlaneseq  ;;  %v638_v1 = vmov 0.0   ;;  %v268_v5 = vld [vmem:[%s207_s5] sm:$0xff]  ;;  %v269_v6 = vld [vmem:[%s216_s9] sm:$0x3]  ;;  %vm311_vm2 = vcmask 1043456  }
  0x38   : > { %263 = vst [vmem:[#allocation2] sm:$0xf] %v638_v1  ;;  %264 = vst [vmem:[#allocation3] sm:$0xf] %v638_v1  ;;  %v282_v9 = vcombine.high %v268_v5, %v268_v5  ;;  %v298_v10 = vrot.slane %v268_v5, 4  ;;  %p252_p7 = scmp.lt.s32.totalorder %s626_s12, 1 }
  0x39   : > { %265 = vst [vmem:[#allocation4] sm:$0xf] %v638_v1  ;;  %v267_v2 = vshrl.u32 %v266_v0, 7  ;;  %vm323_vm3 = vcmask 7168   ;;  %vm325_vm4 = vcmask 15360   ;;  %vm327_vm5 = vcmask 19456  }
  0x3a   : > { %v300_v13 = vadd.f32 %v298_v10, %v268_v5  ;;  %s797_s12 = smov (!%p252_p7, %s626_s12), 1 }
  0x3b   : > { %v272_v3 = vsub.s32 0, %v267_v2  ;;  %v276_v4 = vsub.s32 1, %v267_v2  ;;  %s457_s20 = sshll.u32 %s797_s12, 2 }
  0x3c   : > { %s258_s15 = scalar_lea.vmem %s784_s2, %s457_s20 }
  0x3d   : > { %v273_v7 = vrot.slane %v269_v6, %v272_v3  ;;  %v277_v8 = vrot.slane %v269_v6, %v276_v4 }
  0x3f   : > { %v296_v11 = vld [vmem:[#allocation3] sm:$0xf]  ;;  %vm278_vm0 = vcmp.eq.s32.totalorder %v273_v7, %v267_v2  ;;  %vm279_vm1 = vcmp.eq.s32.totalorder %v277_v8, %v267_v2  ;;  %v292_v12 = vld [vmem:[#allocation2] sm:$0xf] }
  0x40   : > { %v284_v14 = vsel %vm278_vm0, %v268_v5, 0.0  ;;  %v285_v15 = vsel %vm279_vm1, %v282_v9, 0.0  ;;  %v288_v16 = vsel %vm278_vm0, 1.0, %v638_v1  ;;  %v289_v17 = vsel %vm279_vm1, 1.0, %v638_v1  ;;  %v303_v18 = vld [vmem:[#allocation4] sm:$0xf] }
  0x41   : > { %v293_v19 = vadd.f32 %v285_v15, %v284_v14  ;;  %v301_v20 = vadd.f32 %v300_v13, %v296_v11  ;;  %v304_v21 = vadd.f32 %v289_v17, %v288_v16 }
  0x43   : > { %v294_v22 = vadd.f32 %v293_v19, %v292_v12  ;;  %302 = vst [vmem:[#allocation3] sm:$0xf] %v301_v20  ;;  %v305_v23 = vadd.f32 %v304_v21, %v303_v18 }
  0x45   : > { %295 = vst [vmem:[#allocation2] sm:$0xf] %v294_v22  ;;  %306 = vst [vmem:[#allocation4] sm:$0xf] %v305_v23 }
  0x4a   : > { %v315_v25 = vld [vmem:[#allocation3] sm:$0xf] }
  0x4b   : > { %v316_v29 = vsel %vm311_vm2, %v315_v25, 0.0 }
  0x4c   : > { %v310_v24 = vld [vmem:[#allocation2] sm:$0xf]  ;;  %v319_v26 = vld [vmem:[#allocation4] sm:$0xf] }
  0x4d   : > { %v312_v27 = vsel %vm311_vm2, %v310_v24, 0.0  ;;  %v320_v28 = vsel %vm311_vm2, %v319_v26, 0.0 }
  0x4e   : > { %313 = vadd.xlane.f32.xlu0 %v312_v27  ;;  %321 = vadd.xlane.f32.xlu1 %v320_v28 }
  0x52   : > { %317 = vadd.xlane.f32.xlu0 %v316_v29 }
  0xd7   : > { %v314_v30 = vpop.xlane.xlu0 %313  ;;  %v322_v31 = vpop.xlane.xlu1 %321 }
  0xdb   : > { %v318_v32 = vpop.xlane.xlu0 %317 }
  0xdc   : > { %v324_v33 = vsel %vm323_vm3, %v314_v30, %v318_v32 }
  0xdd   : > { %v326_v34 = vsel %vm325_vm4, %v324_v33, %v322_v31 }
  0xde   : > { %328 = vst.msk [vmem:[%s258_s15] sm:$0xf] %vm327_vm5, %v326_v34 }
  0xdf PF: > { %s18_s14 = sadd.s32 1, %s634_s14   ;;  %s789_s9 = smov %s618_s10 }
  0xe0   : > { %p15_p9 = scmp.ge.s32.totalorder %s18_s14, 4   ;;  %s790_s10 = smov %s622_s11 }
  0xe1   : > { %s791_s11 = smov %s703_s21  ;;  %s792_s12 = smov %s630_s13 }
  0xe2   : > { %s793_s13 = smov %s795_s16  ;;  %17 = sbr.rel (!%p15_p9) target bundleno = 6 (0x6), region = 89 }
  0xe7   :  { %354 = vsyncpa [#allocation6], 1 }
  0xe8   :  { %356 = vsyncpa [#allocation6 + $0x1], 1 }
  0xe9   :  { %357 = vsyncpa [#allocation8], 1 }
  0xea   :  { %359 = vsyncpa [#allocation8 + $0x1], 1 }

</bundles_post_ra>
